<compile_context>
chip_gen: v7x
topology: tpu7x:2x2x1
jax: 0.10.0
libtpu: 0.0.40
codegen_flags: <defaults>
</compile_context>

<pallas_src>
import functools

import jax
import jax.numpy as jnp
from jax.experimental import pallas as pl
from jax.experimental.pallas import tpu as pltpu


def _round_up(n, m):
    return ((n + m - 1) // m) * m


def _mlp_kernel(x_ref, w1_ref, b1_ref, w2_ref, b2_ref, w3_ref, b3_ref, o_ref):
    # fc1 + ReLU   (bf16 x bf16 -> f32 accumulate)
    h1 = jnp.dot(x_ref[...], w1_ref[...], preferred_element_type=jnp.float32)
    h1 = jnp.maximum(h1 + b1_ref[...], 0.0)
    # fc2 + ReLU   (hidden dim padded to 128 -> full-vreg VPU ops)
    h2 = jnp.dot(h1.astype(jnp.bfloat16), w2_ref[...],
                 preferred_element_type=jnp.float32)
    h2 = jnp.maximum(h2 + b2_ref[...], 0.0)
    # fc3 + Tanh   (lane-dense padded output width; tanh on the EUP)
    h3 = jnp.dot(h2.astype(jnp.bfloat16), w3_ref[...],
                 preferred_element_type=jnp.float32)
    o_ref[...] = jnp.tanh(h3 + b3_ref[...]).astype(o_ref.dtype)


@functools.partial(jax.jit, static_argnames=("tb",))
def toxicity_generator(x, params, *, tb=512):
    """Fused forward pass of ToxicityGenerator.

    x: (B, latent_dim) float32
    params: dict with w1 (L,128), b1 (1,128), w2 (128,64), b2 (1,64),
            w3 (64,O), b3 (1,O)   -- weights stored as (in, out)
    returns: (B, O) float32
    """
    B, L = x.shape
    H1 = params["w1"].shape[1]           # 128
    H2 = params["w2"].shape[1]           # 64
    out_dim = params["w3"].shape[1]

    # ---- layout plumbing ---------------------------------------------------
    H2p = _round_up(max(H2, 128), 128)               # lane-dense hidden width
    out_pad = _round_up(max(out_dim, 128), 128)      # lane-dense store width
    TB = min(tb, _round_up(B, 16))                   # >=16 rows (bf16 sublanes)
    Bp = _round_up(B, TB)
    n_tiles = Bp // TB

    x_p = jnp.pad(x, ((0, Bp - B), (0, 0))).astype(jnp.bfloat16)
    w1 = params["w1"].astype(jnp.bfloat16)
    b1 = params["b1"].astype(jnp.float32)
    w2 = jnp.pad(params["w2"], ((0, 0), (0, H2p - H2))).astype(jnp.bfloat16)
    b2 = jnp.pad(params["b2"], ((0, 0), (0, H2p - H2))).astype(jnp.float32)
    w3 = jnp.pad(params["w3"],
                 ((0, H2p - H2), (0, out_pad - out_dim))).astype(jnp.bfloat16)
    b3 = jnp.pad(params["b3"], ((0, 0), (0, out_pad - out_dim))).astype(jnp.float32)

    flops = 2 * Bp * (L * H1 + H1 * H2p + H2p * out_pad)
    bytes_accessed = (x_p.size * 2 + w1.size * 2 + w2.size * 2 + w3.size * 2
                      + (b1.size + b2.size + b3.size) * 4 + Bp * out_pad * 4)
    cost = pl.CostEstimate(flops=flops, transcendentals=Bp * out_pad,
                           bytes_accessed=bytes_accessed)

    resident = lambda shape: pl.BlockSpec(shape, lambda i: (0, 0))

    out = pl.pallas_call(
        _mlp_kernel,
        out_shape=jax.ShapeDtypeStruct((Bp, out_pad), jnp.float32),
        grid=(n_tiles,),
        in_specs=[
            pl.BlockSpec((TB, L), lambda i: (i, 0)),   # x: tiled over batch
            resident((L, H1)),                         # weights/biases stay
            resident((1, H1)),                         # resident in VMEM
            resident((H1, H2p)),
            resident((1, H2p)),
            resident((H2p, out_pad)),
            resident((1, out_pad)),
        ],
        out_specs=pl.BlockSpec((TB, out_pad), lambda i: (i, 0)),
        compiler_params=pltpu.CompilerParams(
            dimension_semantics=("parallel",),         # v7x: shard over 2 TCs
            vmem_limit_bytes=32 << 20,                 # safe on v7x's 64 MiB
        ),
        cost_estimate=cost,
    )(x_p, w1, b1, w2, b2, w3, b3)

    return out[:B, :out_dim]


def init_params(key, latent_dim, output_dim):
    """Deterministic init mimicking nn.Linear's uniform(-1/sqrt(in), 1/sqrt(in))."""
    ks = jax.random.split(key, 6)

    def linear(kw, kb, fan_in, fan_out):
        bound = 1.0 / jnp.sqrt(jnp.float32(fan_in))
        w = jax.random.uniform(kw, (fan_in, fan_out), jnp.float32, -bound, bound)
        b = jax.random.uniform(kb, (1, fan_out), jnp.float32, -bound, bound)
        return w, b

    w1, b1 = linear(ks[0], ks[1], latent_dim, 128)
    w2, b2 = linear(ks[2], ks[3], 128, 64)
    w3, b3 = linear(ks[4], ks[5], 64, output_dim)
    return {"w1": w1, "b1": b1, "w2": w2, "b2": b2, "w3": w3, "b3": b3}


def reference(x, p):
    h = jnp.maximum(x @ p["w1"] + p["b1"], 0.0)
    h = jnp.maximum(h @ p["w2"] + p["b2"], 0.0)
    return jnp.tanh(h @ p["w3"] + p["b3"])


if __name__ == "__main__":
    key = jax.random.PRNGKey(0)
    k_x, k_p, k_x2 = jax.random.split(key, 3)

    batch, latent_dim, output_dim = 8, 32, 16
    x = jax.random.normal(k_x, (batch, latent_dim), dtype=jnp.float32)
    params = init_params(k_p, latent_dim, output_dim)

    out = jax.block_until_ready(toxicity_generator(x, params))
    ref = reference(x, params)
    assert out.shape == (batch, output_dim)
    # bf16 MXU inputs with f32 accumulation; tanh output is in [-1, 1].
    assert jnp.allclose(out, ref, atol=2e-2, rtol=2e-2)

    # Exercise a multi-tile grid (non-divisible batch, small tile) as well.
    x2 = jax.random.normal(k_x2, (72, latent_dim), dtype=jnp.float32)
    out2 = jax.block_until_ready(toxicity_generator(x2, params, tb=16))
    ref2 = reference(x2, params)
    assert out2.shape == (72, output_dim)
    assert jnp.allclose(out2, ref2, atol=2e-2, rtol=2e-2)

    print("KERNEL_OK")
</pallas_src>

<mosaic_0001>
module attributes {stable_mosaic.version = 11 : i64} {
  func.func @_mlp_kernel(%arg0: i32, %arg1: memref<16x32xbf16, #tpu.memory_space<vmem>>, %arg2: memref<32x128xbf16, #tpu.memory_space<vmem>>, %arg3: memref<1x128xf32, #tpu.memory_space<vmem>>, %arg4: memref<128x128xbf16, #tpu.memory_space<vmem>>, %arg5: memref<1x128xf32, #tpu.memory_space<vmem>>, %arg6: memref<128x128xbf16, #tpu.memory_space<vmem>>, %arg7: memref<1x128xf32, #tpu.memory_space<vmem>>, %arg8: memref<16x128xf32, #tpu.memory_space<vmem>>) attributes {dimension_semantics = [#tpu.dimension_semantics<parallel>], iteration_bounds = array<i64: 1>, scalar_prefetch = 0 : i64, scratch_operands = 0 : i64, tpu.core_type = #tpu.core_type<tc>, window_params = [{transform_indices = @transform_0, window_bounds = array<i64: 16, 32>}, {pipeline_mode = #tpu.pipeline_mode<synchronous>, transform_indices = @transform_1, window_bounds = array<i64: 32, 128>}, {pipeline_mode = #tpu.pipeline_mode<synchronous>, transform_indices = @transform_2, window_bounds = array<i64: 1, 128>}, {pipeline_mode = #tpu.pipeline_mode<synchronous>, transform_indices = @transform_3, window_bounds = array<i64: 128, 128>}, {pipeline_mode = #tpu.pipeline_mode<synchronous>, transform_indices = @transform_4, window_bounds = array<i64: 1, 128>}, {pipeline_mode = #tpu.pipeline_mode<synchronous>, transform_indices = @transform_5, window_bounds = array<i64: 128, 128>}, {pipeline_mode = #tpu.pipeline_mode<synchronous>, transform_indices = @transform_6, window_bounds = array<i64: 1, 128>}, {transform_indices = @transform_7, window_bounds = array<i64: 16, 128>}]} {
    %c0 = arith.constant 0 : index
    %c0_0 = arith.constant 0 : index
    %0 = vector.load %arg1[%c0, %c0_0] : memref<16x32xbf16, #tpu.memory_space<vmem>>, vector<16x32xbf16>
    %c0_1 = arith.constant 0 : index
    %c0_2 = arith.constant 0 : index
    %1 = vector.load %arg2[%c0_1, %c0_2] : memref<32x128xbf16, #tpu.memory_space<vmem>>, vector<32x128xbf16>
    %cst = arith.constant dense<0.000000e+00> : vector<16x128xf32>
    %2 = tpu.matmul %0, %1, %cst {dimension_numbers = #tpu.dot_dimension_numbers<[1], [0], [0], [1], [0, 0, 1, 1], [], []>} : vector<16x32xbf16>, vector<32x128xbf16>, vector<16x128xf32> -> vector<16x128xf32>
    %c0_3 = arith.constant 0 : index
    %c0_4 = arith.constant 0 : index
    %3 = vector.load %arg3[%c0_3, %c0_4] : memref<1x128xf32, #tpu.memory_space<vmem>>, vector<1x128xf32>
    %4 = vector.broadcast %3 : vector<1x128xf32> to vector<16x128xf32>
    %5 = arith.addf %2, %4 : vector<16x128xf32>
    %cst_5 = arith.constant 0.000000e+00 : f32
    %6 = vector.broadcast %cst_5 : f32 to vector<16x128xf32>
    %7 = arith.maximumf %5, %6 : vector<16x128xf32>
    %8 = arith.truncf %7 : vector<16x128xf32> to vector<16x128xbf16>
    %c0_6 = arith.constant 0 : index
    %c0_7 = arith.constant 0 : index
    %9 = vector.load %arg4[%c0_6, %c0_7] : memref<128x128xbf16, #tpu.memory_space<vmem>>, vector<128x128xbf16>
    %cst_8 = arith.constant dense<0.000000e+00> : vector<16x128xf32>
    %10 = tpu.matmul %8, %9, %cst_8 {dimension_numbers = #tpu.dot_dimension_numbers<[1], [0], [0], [1], [0, 0, 1, 1], [], []>} : vector<16x128xbf16>, vector<128x128xbf16>, vector<16x128xf32> -> vector<16x128xf32>
    %c0_9 = arith.constant 0 : index
    %c0_10 = arith.constant 0 : index
    %11 = vector.load %arg5[%c0_9, %c0_10] : memref<1x128xf32, #tpu.memory_space<vmem>>, vector<1x128xf32>
    %12 = vector.broadcast %11 : vector<1x128xf32> to vector<16x128xf32>
    %13 = arith.addf %10, %12 : vector<16x128xf32>
    %cst_11 = arith.constant 0.000000e+00 : f32
    %14 = vector.broadcast %cst_11 : f32 to vector<16x128xf32>
    %15 = arith.maximumf %13, %14 : vector<16x128xf32>
    %16 = arith.truncf %15 : vector<16x128xf32> to vector<16x128xbf16>
    %c0_12 = arith.constant 0 : index
    %c0_13 = arith.constant 0 : index
    %17 = vector.load %arg6[%c0_12, %c0_13] : memref<128x128xbf16, #tpu.memory_space<vmem>>, vector<128x128xbf16>
    %cst_14 = arith.constant dense<0.000000e+00> : vector<16x128xf32>
    %18 = tpu.matmul %16, %17, %cst_14 {dimension_numbers = #tpu.dot_dimension_numbers<[1], [0], [0], [1], [0, 0, 1, 1], [], []>} : vector<16x128xbf16>, vector<128x128xbf16>, vector<16x128xf32> -> vector<16x128xf32>
    %c0_15 = arith.constant 0 : index
    %c0_16 = arith.constant 0 : index
    %19 = vector.load %arg7[%c0_15, %c0_16] : memref<1x128xf32, #tpu.memory_space<vmem>>, vector<1x128xf32>
    %20 = vector.broadcast %19 : vector<1x128xf32> to vector<16x128xf32>
    %21 = arith.addf %18, %20 : vector<16x128xf32>
    %22 = math.tanh %21 : vector<16x128xf32>
    %c0_17 = arith.constant 0 : index
    %c0_18 = arith.constant 0 : index
    %23 = vector.load %arg8[%c0_17, %c0_18] : memref<16x128xf32, #tpu.memory_space<vmem>>, vector<16x128xf32>
    tpu.vector_store %arg8[%c0_17, %c0_18], %22 {strides = array<i32>} : memref<16x128xf32, #tpu.memory_space<vmem>>, vector<16x128xf32>,
    return
  }
  func.func @transform_0(%arg0: i32) -> (i32, i32) {
    %c0_i32 = arith.constant 0 : i32
    %c0_i32_0 = arith.constant 0 : i32
    return %arg0, %c0_i32 : i32, i32
  }
  func.func @transform_1(%arg0: i32) -> (i32, i32) {
    %c0_i32 = arith.constant 0 : i32
    %c0_i32_0 = arith.constant 0 : i32
    %c0_i32_1 = arith.constant 0 : i32
    return %c0_i32, %c0_i32_0 : i32, i32
  }
  func.func @transform_2(%arg0: i32) -> (i32, i32) {
    %c0_i32 = arith.constant 0 : i32
    %c0_i32_0 = arith.constant 0 : i32
    %c0_i32_1 = arith.constant 0 : i32
    return %c0_i32, %c0_i32_0 : i32, i32
  }
  func.func @transform_3(%arg0: i32) -> (i32, i32) {
    %c0_i32 = arith.constant 0 : i32
    %c0_i32_0 = arith.constant 0 : i32
    %c0_i32_1 = arith.constant 0 : i32
    return %c0_i32, %c0_i32_0 : i32, i32
  }
  func.func @transform_4(%arg0: i32) -> (i32, i32) {
    %c0_i32 = arith.constant 0 : i32
    %c0_i32_0 = arith.constant 0 : i32
    %c0_i32_1 = arith.constant 0 : i32
    return %c0_i32, %c0_i32_0 : i32, i32
  }
  func.func @transform_5(%arg0: i32) -> (i32, i32) {
    %c0_i32 = arith.constant 0 : i32
    %c0_i32_0 = arith.constant 0 : i32
    %c0_i32_1 = arith.constant 0 : i32
    return %c0_i32, %c0_i32_0 : i32, i32
  }
  func.func @transform_6(%arg0: i32) -> (i32, i32) {
    %c0_i32 = arith.constant 0 : i32
    %c0_i32_0 = arith.constant 0 : i32
    %c0_i32_1 = arith.constant 0 : i32
    return %c0_i32, %c0_i32_0 : i32, i32
  }
  func.func @transform_7(%arg0: i32) -> (i32, i32) {
    %c0_i32 = arith.constant 0 : i32
    %c0_i32_0 = arith.constant 0 : i32
    return %arg0, %c0_i32 : i32, i32
  }
}

</mosaic_0001>

<bundles_post_ra>
// kernel: toxicity_generator.1
= control target key start
LH: loop header
LB: loop body
LE: loop exit
PB: predicated region body
PF: predicated region fallthrough
CT: control target
= control target key end

     0   :  { %v457_v0 = vmov 0.0   ;;  %vm458_vm0 = vmmov 0   ;;  %vm57_vm1 = vcmask 261120   ;;  %s595_s1 = inlined_call_operand.vmem [shape: bf16[32,128], index: 1, kind: input, shape index: {}]   ;;  %s596_s3 = inlined_call_operand.vmem [shape: bf16[128,128], index: 3, kind: input, shape index: {}]   ;;  %s597_s0 = inlined_call_operand.vmem [shape: bf16[16,32], index: 0, kind: input, shape index: {}]   ;;  %s598_s5 = inlined_call_operand.vmem [shape: bf16[128,128], index: 5, kind: input, shape index: {}]   ;;  %s599_s2 = inlined_call_operand.vmem [shape: f32[1,128], index: 2, kind: input, shape index: {}]   ;;  %s600_s4 = inlined_call_operand.vmem [shape: f32[1,128], index: 4, kind: input, shape index: {}]   ;;  %s601_s6 = inlined_call_operand.vmem [shape: f32[1,128], index: 6, kind: input, shape index: {}]   ;;  %s602_s7 = inlined_call_operand.vmem [shape: f32[16,128], index: 7, kind: output, shape index: {}]  }
   0x1   :  { %384 = vmatprep.subr.bf16.mxu0 %v457_v0  ;;  %v434_v1 = vld [vmem:[%s595_s1] sm:$0xff]   ;;  %388 = vmatprep.mubr.msk.bf16.mxu0 %vm458_vm0, %v457_v0  ;;  %v435_v2 = vld [vmem:[%s595_s1 + $0x8] sm:$0xff]   ;;  %v439_v6 = vld [vmem:[%s596_s3 + $0x10] sm:$0xff]  }
   0x2   :  { %392 = vmatprep.subr.bf16.mxu1 %v457_v0  ;;  %408 = vmatprep.mubr.msk.bf16.mxu1 %vm458_vm0, %v457_v0  ;;  %v437_v3 = vld [vmem:[%s596_s3] sm:$0xff]   ;;  %v438_v5 = vld [vmem:[%s596_s3 + $0x8] sm:$0xff]   ;;  %v440_v7 = vld [vmem:[%s596_s3 + $0x18] sm:$0xff]  }
   0x3   :  { %385 = vmatpush3.bf16.msra.mxu0 %v434_v1  ;;  %v436_v4 = vld [vmem:[%s597_s0] sm:$0xff]   ;;  %393 = vmatpush3.bf16.msra.mxu1 %v437_v3  ;;  %v442_v9 = vld [vmem:[%s596_s3 + $0x28] sm:$0xff]   ;;  %v443_v10 = vld [vmem:[%s596_s3 + $0x30] sm:$0xff]  }
   0x4   :  { %386 = vmatprep.subr.bf16.mxu0 %v457_v0  ;;  %394 = vmatprep.subr.bf16.mxu1 %v457_v0  ;;  %v441_v8 = vld [vmem:[%s596_s3 + $0x20] sm:$0xff]   ;;  %v444_v11 = vld [vmem:[%s596_s3 + $0x38] sm:$0xff]   ;;  %v446_v13 = vld [vmem:[%s598_s5 + $0x8] sm:$0xff]  }
   0x5   :  { %v445_v12 = vld [vmem:[%s598_s5] sm:$0xff]   ;;  %v447_v14 = vld [vmem:[%s598_s5 + $0x10] sm:$0xff]   ;;  %v448_v15 = vld [vmem:[%s598_s5 + $0x18] sm:$0xff]  }
   0x6   :  { %v449_v16 = vld [vmem:[%s598_s5 + $0x20] sm:$0xff]   ;;  %v450_v17 = vld [vmem:[%s598_s5 + $0x28] sm:$0xff]   ;;  %v451_v28 = vld [vmem:[%s598_s5 + $0x30] sm:$0xff]  }
   0x7   :  { %387 = vmatpush3.bf16.msra.mxu0 %v435_v2  ;;  %395 = vmatpush3.bf16.msra.mxu1 %v438_v5  ;;  %v340_v18 = vld [vmem:[%s599_s2] ss:$0 sm:$0xff]  ;;  %v452_v29 = vld [vmem:[%s598_s5 + $0x38] sm:$0xff]  }
   0x8   :  { %412 = vmatprep.subr.bf16.mxu0 %v457_v0  ;;  %396 = vmatprep.subr.bf16.mxu1 %v457_v0  ;;  %v345_v30 = vld [vmem:[%s600_s4] ss:$0 sm:$0xff] }
   0x9   :  { %v354_v40 = vld [vmem:[%s601_s6] ss:$0 sm:$0xff] }
   0xa   :  { %389 = vmatmul.mubr.msk.bf16.vlgmr.msra.gmra.mrb[0].mxu0 %vm57_vm1, %v436_v4 }
   0xb   :  { %428 = vmatprep.mubr.msk.bf16.mxu0 %vm458_vm0, %v457_v0  ;;  %397 = vmatpush3.bf16.msra.mxu1 %v439_v6 }
   0xc   :  { %398 = vmatprep.subr.bf16.mxu1 %v457_v0  ;;  %413 = vmatpush3.bf16.msra.mxu0 %v445_v12 }
   0xd   :  { %414 = vmatprep.subr.bf16.mxu0 %v457_v0 }
   0xf   :  { %399 = vmatpush3.bf16.msra.mxu1 %v440_v7 }
  0x10   :  { %400 = vmatprep.subr.bf16.mxu1 %v457_v0  ;;  %415 = vmatpush3.bf16.msra.mxu0 %v446_v13 }
  0x11   :  { %416 = vmatprep.subr.bf16.mxu0 %v457_v0 }
  0x13   :  { %401 = vmatpush3.bf16.msra.mxu1 %v441_v8 }
  0x14   :  { %402 = vmatprep.subr.bf16.mxu1 %v457_v0  ;;  %417 = vmatpush3.bf16.msra.mxu0 %v447_v14 }
  0x15   :  { %418 = vmatprep.subr.bf16.mxu0 %v457_v0 }
  0x17   :  { %403 = vmatpush3.bf16.msra.mxu1 %v442_v9 }
  0x18   :  { %404 = vmatprep.subr.bf16.mxu1 %v457_v0  ;;  %419 = vmatpush3.bf16.msra.mxu0 %v448_v15 }
  0x19   :  { %420 = vmatprep.subr.bf16.mxu0 %v457_v0 }
  0x1b   :  { %405 = vmatpush3.bf16.msra.mxu1 %v443_v10 }
  0x1c   :  { %406 = vmatprep.subr.bf16.mxu1 %v457_v0  ;;  %421 = vmatpush3.bf16.msra.mxu0 %v449_v16 }
  0x1d   :  { %422 = vmatprep.subr.bf16.mxu0 %v457_v0 }
  0x1f   :  { %407 = vmatpush3.bf16.msra.mxu1 %v444_v11 }
  0x20   :  { %423 = vmatpush3.bf16.msra.mxu0 %v450_v17 }
  0x21   :  { %424 = vmatprep.subr.bf16.mxu0 %v457_v0 }
  0x24   :  { %425 = vmatpush3.bf16.msra.mxu0 %v451_v28 }
  0x25   :  { %426 = vmatprep.subr.bf16.mxu0 %v457_v0 }
  0x28   :  { %427 = vmatpush3.bf16.msra.mxu0 %v452_v29 }
  0xdd   :  { %v95_v19 = vpop.f32.mrb[0].mxu0 }
  0xde   :  { %v96_v20 = vadd.f32 %v340_v18, %v95_v19  ;;  %v390_v21 = vpop.f32.mrb[1].mxu0 }
  0xdf   :  { %v98_v22 = vpop.f32.mrb[2].mxu0 }
  0xe0   :  { %v99_v23 = vadd.f32 %v340_v18, %v98_v22  ;;  %v391_v24 = vpop.f32.mrb[3].mxu0  ;;  %v102_v25 = vmax.f32 %v96_v20, 0.0 }
  0xe2   :  { %v103_v26 = vmax.f32 %v99_v23, 0.0 }
  0xe4   :  { %v104_v27 = vpack.c.bf16 %v103_v26, %v102_v25 }
  0xe6   :  { %409 = vmatmul.mubr.bf16.vlgmr.msra.gmra.mrb[0].mxu1 %v104_v27 }
 0x1b9   :  { %v210_v31 = vpop.f32.mrb[0].mxu1 }
 0x1ba   :  { %v211_v32 = vadd.f32 %v345_v30, %v210_v31  ;;  %v410_v33 = vpop.f32.mrb[1].mxu1 }
 0x1bb   :  { %v213_v34 = vpop.f32.mrb[2].mxu1 }
 0x1bc   :  { %v214_v35 = vadd.f32 %v345_v30, %v213_v34  ;;  %v411_v36 = vpop.f32.mrb[3].mxu1  ;;  %v217_v37 = vmax.f32 %v211_v32, 0.0 }
 0x1be   :  { %v218_v38 = vmax.f32 %v214_v35, 0.0 }
 0x1c0   :  { %v219_v39 = vpack.c.bf16 %v218_v38, %v217_v37 }
 0x1c2   :  { %429 = vmatmul.mubr.bf16.vlgmr.msra.gmra.mrb[4].mxu0 %v219_v39 }
 0x295   :  { %v325_v41 = vpop.f32.mrb[4].mxu0 }
 0x296   :  { %v326_v42 = vadd.f32 %v354_v40, %v325_v41  ;;  %v430_v43 = vpop.f32.mrb[5].mxu0 }
 0x297   :  { %v328_v44 = vpop.f32.mrb[6].mxu0 }
 0x298   :  { %453 = vtanh.f32 %v326_v42  ;;  %v329_v45 = vadd.f32 %v354_v40, %v328_v44  ;;  %v431_v46 = vpop.f32.mrb[7].mxu0 }
 0x29a   :  { %455 = vtanh.f32 %v329_v45 }
 0x2a2   :  { %v454_v47 = vpop.eup %453 }
 0x2a3   :  { %334 = vst [vmem:[%s602_s7] sm:$0xff] %v454_v47 }
 0x2a4   :  { %v456_v48 = vpop.eup %455 }
 0x2a5   :  { %335 = vst [vmem:[%s602_s7 + $0x8] sm:$0xff] %v456_v48 }

</bundles_post_ra>
